<compile_context>
chip_gen: v7x
topology: tpu7x:2x2x1
jax: 0.10.0
libtpu: 0.0.40
codegen_flags: <defaults>
</compile_context>

<pallas_src>
import functools

import jax
import jax.numpy as jnp
from jax.experimental import pallas as pl
from jax.experimental.pallas import tpu as pltpu


def _layernorm_kernel(x_ref, gamma_ref, beta_ref, o_ref, *, eps):
    x = x_ref[...].astype(jnp.float32)           # (tile_rows, F)
    gamma = gamma_ref[...].astype(jnp.float32)   # (1, F)
    beta = beta_ref[...].astype(jnp.float32)     # (1, F)

    n = x.shape[-1]
    # One pass: sum and sum-of-squares are independent cross-lane reductions.
    s = jnp.sum(x, axis=-1, keepdims=True)
    sq = jnp.sum(x * x, axis=-1, keepdims=True)
    mean = s * (1.0 / n)
    # torch.std default is unbiased (ddof=1); clamp guards tiny negative from
    # cancellation (and NaN garbage rows of a ragged last block stay NaN, which
    # is fine -- those rows are never written back).
    var = jnp.maximum(sq - n * (mean * mean), 0.0) * (1.0 / (n - 1))
    std = jnp.sqrt(var)

    # Per-row reciprocal on the EUP (approx) + one Newton-Raphson refinement to
    # recover ~f32 precision; replaces tile_rows*F divides with cheap column ops.
    d = std + eps
    inv = pl.reciprocal(d, approx=True)
    inv = inv * (2.0 - d * inv)

    out = (x - mean) * inv * gamma + beta
    o_ref[...] = out.astype(o_ref.dtype)


def _round_up(x, m):
    return ((x + m - 1) // m) * m


def _choose_tile_rows(rows, features, itemsize, vmem_budget_bytes):
    # Double-buffered x-in + out tiles cost ~4 * tile_rows * F * itemsize bytes.
    per_row = 4 * features * itemsize
    tr = max(8, vmem_budget_bytes // per_row)
    tr = min(tr, 1024)
    # No point exceeding the (rounded-up) number of rows.
    tr = min(tr, _round_up(rows, 8))
    # Keep >= 2 grid steps when possible so v7x's two TensorCores both get work.
    if rows >= 16:
        tr = min(tr, _round_up(pl.cdiv(rows, 2), 8))
    tr = max(8, (tr // 8) * 8)
    return int(tr)


def layer_norm(x, a_2, b_2, eps=1e-6, *, tile_rows=None,
               vmem_budget_bytes=32 << 20):
    """x: (..., features). a_2, b_2: (features,)."""
    orig_shape = x.shape
    features = orig_shape[-1]
    assert features > 1, "unbiased std needs features > 1 (divides by n - 1)"

    rows = 1
    for d in orig_shape[:-1]:
        rows *= d
    x2 = x.reshape(rows, features)

    itemsize = jnp.dtype(x.dtype).itemsize
    if tile_rows is None:
        tile_rows = _choose_tile_rows(rows, features, itemsize, vmem_budget_bytes)
    tile_rows = max(8, _round_up(int(tile_rows), 8))

    gamma = a_2.reshape(1, features)
    beta = b_2.reshape(1, features)

    grid = (pl.cdiv(rows, tile_rows),)   # ragged last block handled by Pallas
    kernel = functools.partial(_layernorm_kernel, eps=float(eps))

    out = pl.pallas_call(
        kernel,
        out_shape=jax.ShapeDtypeStruct((rows, features), x.dtype),
        grid_spec=pltpu.PrefetchScalarGridSpec(
            num_scalar_prefetch=0,
            grid=grid,
            in_specs=[
                pl.BlockSpec((tile_rows, features), lambda i: (i, 0)),
                pl.BlockSpec((1, features), lambda i: (0, 0)),
                pl.BlockSpec((1, features), lambda i: (0, 0)),
            ],
            out_specs=pl.BlockSpec((tile_rows, features), lambda i: (i, 0)),
        ),
        compiler_params=pltpu.CompilerParams(
            dimension_semantics=("parallel",),
            vmem_limit_bytes=48 << 20,   # > v5e/v6e scoped defaults, < v7x 64 MiB
        ),
    )(x2, gamma, beta)

    return out.reshape(orig_shape)


if __name__ == "__main__":
    batch, seq, hidden = 2, 8, 32
    key = jax.random.PRNGKey(0)
    x = jax.random.normal(key, (batch, seq, hidden), dtype=jnp.float32)

    # deterministic parameter init, matching nn.Parameter(ones/zeros(features))
    a_2 = jnp.ones((hidden,), dtype=jnp.float32)
    b_2 = jnp.zeros((hidden,), dtype=jnp.float32)
    eps = 1e-6

    out = layer_norm(x, a_2, b_2, eps)
    out = jax.block_until_ready(out)

    # reference check (pure JAX, matching torch semantics: unbiased std, eps on std)
    mean = jnp.mean(x, axis=-1, keepdims=True)
    std = jnp.sqrt(jnp.sum((x - mean) ** 2, axis=-1, keepdims=True) / (hidden - 1))
    ref = a_2 * (x - mean) / (std + eps) + b_2
    assert jnp.allclose(out, ref, atol=1e-5, rtol=1e-5), "mismatch vs reference"

    print("KERNEL_OK")
</pallas_src>

<mosaic_0001>
module attributes {stable_mosaic.version = 11 : i64} {
  func.func @_layernorm_kernel(%arg0: i32, %arg1: memref<8x32xf32, #tpu.memory_space<vmem>>, %arg2: memref<1x32xf32, #tpu.memory_space<vmem>>, %arg3: memref<1x32xf32, #tpu.memory_space<vmem>>, %arg4: memref<8x32xf32, #tpu.memory_space<vmem>>) attributes {dimension_semantics = [#tpu.dimension_semantics<parallel>], iteration_bounds = array<i64: 2>, scalar_prefetch = 0 : i64, scratch_operands = 0 : i64, tpu.core_type = #tpu.core_type<tc>, window_params = [{transform_indices = @transform_0, window_bounds = array<i64: 8, 32>}, {pipeline_mode = #tpu.pipeline_mode<synchronous>, transform_indices = @transform_1, window_bounds = array<i64: 1, 32>}, {pipeline_mode = #tpu.pipeline_mode<synchronous>, transform_indices = @transform_2, window_bounds = array<i64: 1, 32>}, {transform_indices = @transform_3, window_bounds = array<i64: 8, 32>}]} {
    %c0 = arith.constant 0 : index
    %c0_0 = arith.constant 0 : index
    %0 = vector.load %arg1[%c0, %c0_0] : memref<8x32xf32, #tpu.memory_space<vmem>>, vector<8x32xf32>
    %c0_1 = arith.constant 0 : index
    %c0_2 = arith.constant 0 : index
    %1 = vector.load %arg2[%c0_1, %c0_2] : memref<1x32xf32, #tpu.memory_space<vmem>>, vector<1x32xf32>
    %c0_3 = arith.constant 0 : index
    %c0_4 = arith.constant 0 : index
    %2 = vector.load %arg3[%c0_3, %c0_4] : memref<1x32xf32, #tpu.memory_space<vmem>>, vector<1x32xf32>
    %cst = arith.constant dense<0.000000e+00> : vector<8xf32>
    %3 = vector.multi_reduction <add>, %0, %cst [1] : vector<8x32xf32> to vector<8xf32>
    %4 = vector.shape_cast %3 : vector<8xf32> to vector<8x1xf32>
    %5 = arith.mulf %0, %0 : vector<8x32xf32>
    %cst_5 = arith.constant dense<0.000000e+00> : vector<8xf32>
    %6 = vector.multi_reduction <add>, %5, %cst_5 [1] : vector<8x32xf32> to vector<8xf32>
    %7 = vector.shape_cast %6 : vector<8xf32> to vector<8x1xf32>
    %cst_6 = arith.constant 3.125000e-02 : f32
    %8 = vector.broadcast %cst_6 : f32 to vector<8x1xf32>
    %9 = arith.mulf %4, %8 : vector<8x1xf32>
    %10 = arith.mulf %9, %9 : vector<8x1xf32>
    %cst_7 = arith.constant 3.200000e+01 : f32
    %11 = vector.broadcast %cst_7 : f32 to vector<8x1xf32>
    %12 = arith.mulf %11, %10 : vector<8x1xf32>
    %13 = arith.subf %7, %12 : vector<8x1xf32>
    %cst_8 = arith.constant 0.000000e+00 : f32
    %14 = vector.broadcast %cst_8 : f32 to vector<8x1xf32>
    %15 = arith.maximumf %13, %14 : vector<8x1xf32>
    %cst_9 = arith.constant 0.0322580636 : f32
    %16 = vector.broadcast %cst_9 : f32 to vector<8x1xf32>
    %17 = arith.mulf %15, %16 : vector<8x1xf32>
    %18 = math.sqrt %17 : vector<8x1xf32>
    %cst_10 = arith.constant 9.99999997E-7 : f32
    %19 = vector.broadcast %cst_10 : f32 to vector<8x1xf32>
    %20 = arith.addf %18, %19 : vector<8x1xf32>
    %21 = tpu.reciprocal %20 {approx = true} : vector<8x1xf32> -> vector<8x1xf32>
    %22 = arith.mulf %20, %21 : vector<8x1xf32>
    %cst_11 = arith.constant 2.000000e+00 : f32
    %23 = vector.broadcast %cst_11 : f32 to vector<8x1xf32>
    %24 = arith.subf %23, %22 : vector<8x1xf32>
    %25 = arith.mulf %21, %24 : vector<8x1xf32>
    %26 = vector.broadcast %9 : vector<8x1xf32> to vector<8x32xf32>
    %27 = arith.subf %0, %26 : vector<8x32xf32>
    %28 = vector.broadcast %25 : vector<8x1xf32> to vector<8x32xf32>
    %29 = arith.mulf %27, %28 : vector<8x32xf32>
    %30 = vector.broadcast %1 : vector<1x32xf32> to vector<8x32xf32>
    %31 = arith.mulf %29, %30 : vector<8x32xf32>
    %32 = vector.broadcast %2 : vector<1x32xf32> to vector<8x32xf32>
    %33 = arith.addf %31, %32 : vector<8x32xf32>
    %c0_12 = arith.constant 0 : index
    %c0_13 = arith.constant 0 : index
    %34 = vector.load %arg4[%c0_12, %c0_13] : memref<8x32xf32, #tpu.memory_space<vmem>>, vector<8x32xf32>
    tpu.vector_store %arg4[%c0_12, %c0_13], %33 {strides = array<i32>} : memref<8x32xf32, #tpu.memory_space<vmem>>, vector<8x32xf32>,
    return
  }
  func.func @transform_0(%arg0: i32) -> (i32, i32) {
    %c0_i32 = arith.constant 0 : i32
    %c0_i32_0 = arith.constant 0 : i32
    return %arg0, %c0_i32 : i32, i32
  }
  func.func @transform_1(%arg0: i32) -> (i32, i32) {
    %c0_i32 = arith.constant 0 : i32
    %c0_i32_0 = arith.constant 0 : i32
    %c0_i32_1 = arith.constant 0 : i32
    return %c0_i32, %c0_i32_0 : i32, i32
  }
  func.func @transform_2(%arg0: i32) -> (i32, i32) {
    %c0_i32 = arith.constant 0 : i32
    %c0_i32_0 = arith.constant 0 : i32
    %c0_i32_1 = arith.constant 0 : i32
    return %c0_i32, %c0_i32_0 : i32, i32
  }
  func.func @transform_3(%arg0: i32) -> (i32, i32) {
    %c0_i32 = arith.constant 0 : i32
    %c0_i32_0 = arith.constant 0 : i32
    return %arg0, %c0_i32 : i32, i32
  }
}

</mosaic_0001>

<bundles_post_ra>
// kernel: tpu_custom_call.1
= control target key start
LH: loop header
LB: loop body
LE: loop exit
PB: predicated region body
PF: predicated region fallthrough
CT: control target
= control target key end

     0   :  { %8 = vsyncpa [#allocation3], 0  ;;  %s674_s0 = inlined_call_operand.hbm [shape: f32[16,32], index: 0, kind: input, shape index: {}]   ;;  %s675_s1 = inlined_call_operand.vmem [shape: f32[1,32], index: 1, kind: input, shape index: {}]   ;;  %s676_s2 = inlined_call_operand.vmem [shape: f32[1,32], index: 2, kind: input, shape index: {}]   ;;  %s677_s3 = inlined_call_operand.hbm [shape: f32[16,32], index: 3, kind: output, shape index: {}]  }
   0x1   :  { %10 = vsyncpa [#allocation3 + $0x1], 0 }
   0x2   :  { %11 = vsyncpa [#allocation4], 0 }
   0x3   :  { %13 = vsyncpa [#allocation4 + $0x1], 0  ;;  %s500_s12 = smov 0   ;;  %s502_s13 = smov 0  }
   0x4   :  { %s504_s14 = smov 0   ;;  %s506_s15 = smov 0  }
   0x5 LB: > { %s521_s16 = sadd.s32 4294967295, %s476_s15   ;;  %s316_s17 = sadd.s32 4294967294, %s476_s15   ;;  %s476_s15 = sphi %s506_s15, %s692_s15   ;;  %s472_s14 = sphi %s504_s14, %s691_s14   ;;  %s468_s13 = sphi %s502_s13, %s690_s13   ;;  %s464_s12 = sphi %s500_s12, %s689_s12  }
   0x6   : > { %s525_s18 = sadd.s32 1, %s476_s15   ;;  %s26_s19 = sadd.s32 1, %s472_s14 }
   0x7   : > { %s23_s20 = ssub.s32 %s476_s15, %s525_s18  ;;  %p33_p0 = scmp.ne.s32.totalorder %s472_s14, %s468_s13 }
   0x8   : > { %p24_p1 = scmp.eq.s32.totalorder %s23_s20, 0  ;;  %p34_p2 = scmp.eq.s32.totalorder %s476_s15, 0 }
   0x9   : > { %p39_p3 = scmp.ne.s32.totalorder %s468_s13, %s464_s12  ;;  %p40_p4 = scmp.eq.s32.totalorder %s521_s16, 0 }
   0xa   : > { %s537_s21 = scalar_select %p24_p1, %s472_s14, %s26_s19  }
   0xb   : > { %p539_p5 = por %p34_p2, %p33_p0  ;;  %p543_p6 = por %p40_p4, %p39_p3 }
   0xc   : > { %p105_p7 = scmp.eq.s32.totalorder %s521_s16, 1  ;;  %p111_p8 = scmp.eq.s32.totalorder %s316_s17, 1 }
   0xd   : > { %p342_p10 = scmp.lt.s32.totalorder %s476_s15, 2  ;;  %s137_s26 = sand.u32 1, %s472_s14  }
   0xe   : > { %p550_p11 = por %p105_p7, %p33_p0  ;;  %p554_p12 = por %p111_p8, %p39_p3 }
   0xf   : > { %s320_s27 = sshll.u32 %s476_s15, 7  ;;  %s319_s28 = sshll.u32 %s137_s26, 3 }
  0x10   : > { %s681_s24 = scalar_select %p550_p11, 1, 0 }
  0x11   : > { %s682_s25 = scalar_select %p554_p12, 1, 0 }
  0x12   : > { %s563_s4 = scalar_lea.hbm %s674_s0, %s320_s27  ;;  %s141_s5 = scalar_lea.vmem [#allocation2], %s319_s28 }
  0x13   : > { %s148_s6 = sshll.u32 %s141_s5, 4  ;;  %p567_p13 = pnand %p342_p10, %p539_p5  ;;  %s571_s6 = int_to_ptr.vmem [resolvable:$true] %s148_s6 }
  0x14   : > { %s138_s8 = scalar_lea.sflag [#allocation3], %s137_s26  ;;  %s380_s9 = scalar_lea.hbm %s563_s4, 128 }
  0x15   : > { %p381_p2 = scmp.ne.s32.totalorder %s563_s4, %s380_s9  ;;  %p382_p3 = pneg %p567_p13 }
  0x16   : > { %s385_s17 = scalar_lea.hbm %s674_s0, 256  ;;  %p386_p5 = scmp.lt.u32.totalorder %s563_s4, %s674_s0 }
  0x17   : > { %p383_p4 = pnand %p382_p3, %p381_p2  ;;  %p387_p8 = scmp.lt.u32.totalorder %s385_s17, %s380_s9 }
  0x18   : > { %p389_p9 = scmp.lt.u32.totalorder %s380_s9, %s563_s4 }
  0x19   : > { %p384_p7 = pneg %p383_p4  ;;  %p388_p10 = por %p387_p8, %p386_p5 }
  0x1b   : > { %p390_p0 = por %p389_p9, %p388_p10 }
  0x1d   : > { %p391_p1 = pnand %p390_p0, %p384_p7 }
  0x1f   : > { %394 = shalt.err (!%p391_p1)
}
  0x20   : > { %s395_s22 = scalar_lea.vmem %s571_s6, 128  ;;  %s478_s26 = smov [#allocation2]  }
  0x21   : > { %p396_p2 = scmp.ne.s32.totalorder %s571_s6, %s395_s22  ;;  %s400_s27 = sshll.u32 %s478_s26, 4  ;;  %s401_s27 = int_to_ptr.vmem [resolvable:$false] %s400_s27 }
  0x22   : > { %s402_s28 = scalar_lea.vmem %s401_s27, 256  ;;  %p403_p11 = scmp.lt.s32.totalorder %s571_s6, %s401_s27 }
  0x23   : > { %p398_p4 = pnand %p396_p2, %p382_p3  ;;  %p404_p5 = scmp.lt.s32.totalorder %s402_s28, %s395_s22 }
  0x25   : > { %p399_p12 = pneg %p398_p4  ;;  %p405_p8 = por %p404_p5, %p403_p11 }
  0x27   : > { %p406_p9 = pnand %p405_p8, %p399_p12 }
  0x29   : > { %409 = shalt.err (!%p406_p9)
}
  0x2a   : > { %337 = dma.hbm_to_vmem [thread:$0]  (!%p567_p13), %s563_s4, 128, %s571_s6, %s138_s8  }
  0x2b   : > { %p684_p0 = scmp.lt.s32.totalorder %s476_s15, 3  ;;  %p685_p1 = scmp.ge.s32.totalorder %s476_s15, 1 }
  0x2d   : > { %p154_p3 = pnand %p685_p1, %p684_p0 }
  0x2e   : > { %s605_s29 = sand.u32 (!%p154_p3), 1, %s468_s13  }
  0x2f   : > { %157 = sbr.rel (%p154_p3) target bundleno = 265 (0x109), region = 32  ;;  %s322_s30 = sshll.u32 (!%p154_p3), %s605_s29, 3 }
  0x30   : > { %s160_s5 = scalar_lea.sflag (!%p154_p3), [#allocation3], %s605_s29  ;;  %s163_s7 = scalar_lea.vmem (!%p154_p3), [#allocation2], %s322_s30 }
  0x36   : > { %455 = dma.done.wait (%p543_p6), %s160_s5, 128  }
  0x37   : > { %457 = vsyncadd (%p543_p6), %s160_s5, 4294967168  ;;  %vm189_vm0 = vcmask 261120   ;;  %v186_v0 = vld [vmem:[%s163_s7] sm:$0xff]  ;;  %s327_s9 = sshll.u32 %s521_s16, 7  ;;  %s185_s10 = scalar_lea.vmem [#allocation5], %s322_s30 }
  0x38   : > { %v190_v1 = vsel %vm189_vm0, %v186_v0, 0.0  ;;  %v193_v2 = vmul.f32 %v186_v0, %v186_v0  ;;  %v324_v23 = vld [vmem:[%s675_s1] ss:$0 sm:$0xff]  ;;  %s246_s11 = sshll.u32 %s185_s10, 4  ;;  %s629_s20 = scalar_lea.hbm %s677_s3, %s327_s9  ;;  %s631_s11 = int_to_ptr.vmem [resolvable:$true] %s246_s11 }
  0x39   : > { %191 = vadd.xlane.f32.xlu0 %v190_v1  ;;  %v325_v25 = vld [vmem:[%s676_s2] ss:$0 sm:$0xff]  ;;  %s233_s22 = scalar_lea.sflag [#allocation4], %s605_s29  ;;  %s410_s26 = scalar_lea.vmem %s631_s11, 128 }
  0x3a   : > { %v194_v3 = vsel %vm189_vm0, %v193_v2, 0.0  ;;  %p411_p6 = scmp.ne.s32.totalorder %s631_s11, %s410_s26  ;;  %p686_p11 = scmp.ne.s32.totalorder %s681_s24, 0 }
  0x3b   : > { %s479_s16 = smov [#allocation5]  }
  0x3c   : > { %p412_p12 = pnand %p411_p6, %p686_p11  ;;  %s414_s27 = sshll.u32 %s479_s16, 4  ;;  %s415_s27 = int_to_ptr.vmem [resolvable:$false] %s414_s27 }
  0x3d   : > { %195 = vadd.xlane.f32.xlu0 %v194_v3  ;;  %s416_s28 = scalar_lea.vmem %s415_s27, 256  ;;  %p417_p7 = scmp.lt.s32.totalorder %s631_s11, %s415_s27 }
  0x3e   : > { %p413_p13 = pneg %p412_p12  ;;  %p418_p10 = scmp.lt.s32.totalorder %s416_s28, %s410_s26 }
  0x40   : > { %p419_p2 = por %p418_p10, %p417_p7 }
  0x42   : > { %p420_p4 = pnand %p419_p2, %p413_p13 }
  0xc6   : > { %v192_v4 = vpop.xlane.xlu0 %191 }
  0xc7   : > { %v197_v5 = vmul.f32 0.03125, %v192_v4 }
  0xc9   : > { %v198_v6 = vmul.f32 %v197_v5, %v197_v5  ;;  %v215_v21 = vsub.f32 %v186_v0, %v197_v5 }
  0xca   : > { %v196_v7 = vpop.xlane.xlu0 %195 }
  0xcb   : > { %v199_v8 = vmul.f32 32.0, %v198_v6 }
  0xcd   : > { %v200_v9 = vsub.f32 %v196_v7, %v199_v8 }
  0xcf   : > { %v201_v10 = vmax.f32 %v200_v9, 0.0 }
  0xd1   : > { %v202_v11 = vmul.f32 0.032258064, %v201_v10 }
  0xd3   : > { %376 = vrsqrt.f32 %v202_v11  ;;  %vm205_vm1 = vcmp.eq.f32.partialorder %v202_v11, inf  ;;  %v208_v14 = vand.u32 2147483648, %v202_v11  ;;  %vm207_vm2 = vcmp.eq.f32.partialorder %v202_v11, 0.0 }
  0xdd   : > { %v377_v12 = vpop.eup %376 }
  0xde   : > { %v204_v13 = vmul.f32 %v377_v12, %v202_v11 }
  0xe0   : > { %v206_v15 = vsel %vm205_vm1, %v202_v11, %v204_v13 }
  0xe1   : > { %v209_v16 = vsel %vm207_vm2, %v208_v14, %v206_v15 }
  0xe2   : > { %v210_v17 = vadd.f32 1e-06, %v209_v16 }
  0xe4   : > { %378 = vrcp.f32 %v210_v17 }
  0xee   : > { %v379_v18 = vpop.eup %378 }
  0xef   : > { %v212_v19 = vmul.f32 %v379_v18, %v210_v17 }
  0xf1   : > { %v213_v20 = vsub.f32 2.0, %v212_v19 }
  0xf3   : > { %v214_v22 = vmul.f32 %v379_v18, %v213_v20 }
  0xf5   : > { %v216_v24 = vmul.f32 %v215_v21, %v214_v22 }
  0xf7   : > { %v223_v26 = vmul.f32 %v324_v23, %v216_v24 }
  0xf9   : > { %v230_v27 = vadd.f32 %v325_v25, %v223_v26 }
  0xfb   : > { %231 = vst.msk [vmem:[%s185_s10] sm:$0xff] %vm189_vm0, %v230_v27 }
  0xfc   : > { %423 = shalt.err (!%p420_p4)
}
  0xfd   : > { %s424_s29 = scalar_lea.hbm %s629_s20, 128  ;;  %s428_s7 = scalar_lea.hbm %s677_s3, 256 }
  0xfe   : > { %p425_p5 = scmp.ne.s32.totalorder %s629_s20, %s424_s29  ;;  %p429_p0 = scmp.lt.u32.totalorder %s629_s20, %s677_s3 }
  0xff   : > { %p430_p1 = scmp.lt.u32.totalorder %s428_s7, %s424_s29  ;;  %p432_p6 = scmp.lt.u32.totalorder %s424_s29, %s629_s20 }
 0x100   : > { %p426_p8 = pnand %p425_p5, %p686_p11 }
 0x101   : > { %p431_p3 = por %p430_p1, %p429_p0 }
 0x102   : > { %p427_p9 = pneg %p426_p8 }
 0x103   : > { %p433_p12 = por %p432_p6, %p431_p3 }
 0x105   : > { %p434_p13 = pnand %p433_p12, %p427_p9 }
 0x107   : > { %437 = shalt.err (!%p434_p13)
}
 0x108   : > { %332 = dma.vmem_to_hbm [thread:$0]  (%p686_p11), %s631_s11, 128, %s629_s20, %s233_s22  }
 0x109 PF: > { %s258_s6 = sand.u32 1, %s464_s12   ;;  %p687_p7 = scmp.ne.s32.totalorder %s682_s25, 0 }
 0x10a   : > { %p688_p10 = scmp.ge.s32.totalorder %s476_s15, 2  ;;  %s259_s8 = scalar_lea.sflag [#allocation4], %s258_s6 }
 0x10c   : > { %p339_p2 = pnand %p688_p10, %p687_p7 }
 0x10e   : > { %459 = dma.done.wait (!%p339_p2), %s259_s8, 128  }
 0x10f   : > { %461 = vsyncadd (!%p339_p2), %s259_s8, 4294967168  ;;  %p16_p4 = scmp.ge.s32.totalorder %s525_s18, 4   ;;  %s689_s12 = smov %s468_s13 }
 0x110   : > { %s690_s13 = smov %s472_s14  ;;  %s691_s14 = smov %s537_s21 }
 0x111   : > { %s692_s15 = smov %s525_s18  ;;  %18 = sbr.rel (!%p16_p4) target bundleno = 5 (0x5), region = 77 }
 0x118   :  { %264 = vsyncpa [#allocation3], 1 }
 0x119   :  { %266 = vsyncpa [#allocation3 + $0x1], 1 }
 0x11a   :  { %267 = vsyncpa [#allocation4], 1 }
 0x11b   :  { %269 = vsyncpa [#allocation4 + $0x1], 1 }

</bundles_post_ra>
